<compile_context>
chip_gen: v5e
topology: v5e:2x2
jax: 0.10.0
libtpu: 0.0.40
codegen_flags: <defaults>
</compile_context>

<pallas_src>
import functools

import jax
import jax.numpy as jnp
from jax.experimental import pallas as pl
from jax.experimental.pallas import tpu as pltpu

EPS = 1e-5
KPAD = 128  # per-kh K chunk padded to one full 128-lane group


# ----------------------------------------------------------------------------
# Fused kernel: conv(3x3, pad=1) + bias + ReLU + BatchNorm (train mode).
# Whole batch in one grid step; all buffers are tens of KiB (fits any VMEM).
# ----------------------------------------------------------------------------
def _fused_dense_layer_kernel(x_ref, w_ref, b_ref, gb_ref, s_ref, o_ref, *,
                              inv_cnt):
    # x_ref : (N, H+2, 128) f32   halo-padded input, lane = wp*Cin + ci
    #                             (lanes >= (W+2)*Cin are zero)
    # w_ref : (3*128, WC) f32     K-concatenated banded conv weights
    # b_ref : (1, WC) f32         conv bias tiled over w
    # gb_ref: (2, WC) f32         row0 = gamma tiled over w, row1 = beta tiled
    # s_ref : (WC, WC) f32        group-sum matrix (1 where same channel)
    # o_ref : (N, H, WC) f32      BN(ReLU(conv(x))), lane = w*Cout + c
    n = x_ref.shape[0]
    lanes = x_ref.shape[2]
    h = o_ref.shape[1]
    wc = o_ref.shape[2]

    # Three overlapping row windows of the padded input, concatenated along K
    # at 128-lane boundaries -> one MXU push instead of 3*N tiny ones.
    slabs = [x_ref[:, kh:kh + h, :].reshape(n * h, lanes) for kh in range(3)]
    lhs = jnp.concatenate(slabs, axis=-1)                        # (N*H, 384)

    acc = jnp.dot(lhs, w_ref[...], preferred_element_type=jnp.float32)
    acc = acc + b_ref[...]                                        # conv bias
    acc = jnp.maximum(acc, 0.0)                                   # ReLU

    # ---- BatchNorm statistics (biased var over N,H,W), two-pass ----
    # Per-(w,c) column sums -> per-channel totals replicated over w via the
    # group-sum matmul (result is already in the lane-dense (w,c) layout).
    row_sum = jnp.sum(acc, axis=0, keepdims=True)                 # (1, WC)
    mean = jnp.dot(row_sum, s_ref[...],
                   preferred_element_type=jnp.float32) * inv_cnt  # (1, WC)
    dev = acc - mean
    row_sq = jnp.sum(dev * dev, axis=0, keepdims=True)            # (1, WC)
    var = jnp.dot(row_sq, s_ref[...],
                  preferred_element_type=jnp.float32) * inv_cnt   # (1, WC)

    inv_std = jax.lax.rsqrt(var + EPS)                            # EUP slot
    scale = gb_ref[0:1, :] * inv_std
    out = dev * scale + gb_ref[1:2, :]

    o_ref[...] = out.reshape(n, h, wc)


# ----------------------------------------------------------------------------
# Wrapper
# ----------------------------------------------------------------------------
def _banded_weights(w_oihw, W, kpad):
    """(Cout,Cin,3,3) -> (3*kpad, W*Cout) banded weights, kh chunks
    concatenated along K and zero-padded to kpad rows each.

    rows[kh*kpad + wp*Cin + ci, w*Cout + co] = w[co, ci, kh, wp - w]
        if 0 <= wp - w <= 2 else 0
    """
    Cout, Cin, KH, KW = w_oihw.shape
    Wp = W + 2
    w_hwio = jnp.transpose(w_oihw, (2, 3, 1, 0)).astype(jnp.float32)  # KH,KW,Cin,Cout
    wp = jnp.arange(Wp)[:, None]
    wo = jnp.arange(W)[None, :]
    wb = jnp.zeros((KH, Wp * Cin, W * Cout), dtype=jnp.float32)
    for kw in range(KW):
        sel = (wp == wo + kw).astype(jnp.float32)                     # (Wp, W)
        blk = jnp.einsum("pw,hio->hpiwo", sel, w_hwio[:, kw])         # KH,Wp,Cin,W,Cout
        wb = wb + blk.reshape(KH, Wp * Cin, W * Cout)
    wb = jnp.pad(wb, ((0, 0), (0, kpad - Wp * Cin), (0, 0)))
    return wb.reshape(KH * kpad, W * Cout)


def dense_layer_forward(x_nchw, w_oihw, bias, gamma, beta):
    """x: (N,Cin,H,W) f32, w: (Cout,Cin,3,3), bias/gamma/beta: (Cout,).
    Returns (N,Cout,H,W) f32 = BN(ReLU(conv(x))) in PyTorch training mode."""
    N, Cin, H, W = x_nchw.shape
    Cout = w_oihw.shape[0]
    WC = W * Cout
    kin = (W + 2) * Cin

    # --- XLA glue: layout + halo pad + lane pad to 128 (tiny, fused by XLA) ---
    # TODO(synk): if the surrounding net consumes lane-dense NHWC activations,
    # drop these transposes/pads entirely.
    x_nhwc = jnp.transpose(x_nchw, (0, 2, 3, 1)).astype(jnp.float32)
    x_pad = jnp.pad(x_nhwc, ((0, 0), (1, 1), (1, 1), (0, 0)))
    x2d = x_pad.reshape(N, H + 2, kin)
    x2d = jnp.pad(x2d, ((0, 0), (0, 0), (0, KPAD - kin)))          # lanes -> 128

    wb = _banded_weights(w_oihw, W, KPAD)                          # (384, WC) f32
    b_lane = jnp.tile(bias.astype(jnp.float32), W).reshape(1, WC)
    gb_lane = jnp.stack([jnp.tile(gamma.astype(jnp.float32), W),
                         jnp.tile(beta.astype(jnp.float32), W)], axis=0)  # (2, WC)
    lane = jnp.arange(WC)
    gsum = (lane[:, None] % Cout == lane[None, :] % Cout).astype(jnp.float32)

    kernel = functools.partial(_fused_dense_layer_kernel,
                               inv_cnt=1.0 / float(N * H * W))

    out = pl.pallas_call(
        kernel,
        out_shape=jax.ShapeDtypeStruct((N, H, WC), jnp.float32),
        grid_spec=pltpu.PrefetchScalarGridSpec(
            num_scalar_prefetch=0,
            grid=(1,),
            in_specs=[
                pl.BlockSpec((N, H + 2, KPAD), lambda i: (0, 0, 0)),
                pl.BlockSpec((3 * KPAD, WC), lambda i: (0, 0)),
                pl.BlockSpec((1, WC), lambda i: (0, 0)),
                pl.BlockSpec((2, WC), lambda i: (0, 0)),
                pl.BlockSpec((WC, WC), lambda i: (0, 0)),
            ],
            out_specs=pl.BlockSpec((N, H, WC), lambda i: (0, 0, 0)),
        ),
        compiler_params=pltpu.CompilerParams(
            dimension_semantics=("arbitrary",),
            # Scalability guard (v7x has 64 MiB physical VMEM): whole-batch
            # blocks here are <1 MiB; re-grid over N if this layer grows.
            vmem_limit_bytes=32 * 1024 * 1024,
        ),
    )(x2d, wb, b_lane, gb_lane, gsum)

    # Back to PyTorch's NCHW convention.
    return jnp.transpose(out.reshape(N, H, W, Cout), (0, 3, 1, 2))


dense_layer_forward_jit = jax.jit(dense_layer_forward)


if __name__ == "__main__":
    # DenseLayer(inf=4, growth_factor=8) at CIFAR-ish small shapes.
    N, Cin, H, W = 2, 4, 16, 16
    Cout = 8

    key = jax.random.PRNGKey(0)
    kx, kw, kb = jax.random.split(key, 3)

    x = jax.random.normal(kx, (N, Cin, H, W), dtype=jnp.float32)
    fan_in = Cin * 3 * 3
    bound = 1.0 / (fan_in ** 0.5)
    w = jax.random.uniform(kw, (Cout, Cin, 3, 3), jnp.float32, -bound, bound)
    b = jax.random.uniform(kb, (Cout,), jnp.float32, -bound, bound)
    gamma = jnp.ones((Cout,), jnp.float32)   # BatchNorm2d default affine init
    beta = jnp.zeros((Cout,), jnp.float32)

    out = dense_layer_forward_jit(x, w, b, gamma, beta)
    jax.block_until_ready(out)
    assert out.shape == (N, Cout, H, W)

    # Pure-JAX reference (PyTorch training-mode forward semantics).
    ref_conv = jax.lax.conv_general_dilated(
        x, w, (1, 1), ((1, 1), (1, 1)),
        dimension_numbers=("NCHW", "OIHW", "NCHW")) + b.reshape(1, Cout, 1, 1)
    ref_act = jnp.maximum(ref_conv, 0.0)
    mu = jnp.mean(ref_act, axis=(0, 2, 3), keepdims=True)
    var = jnp.mean((ref_act - mu) ** 2, axis=(0, 2, 3), keepdims=True)
    ref = (ref_act - mu) * jax.lax.rsqrt(var + EPS) * gamma.reshape(1, Cout, 1, 1) \
        + beta.reshape(1, Cout, 1, 1)
    err = float(jnp.max(jnp.abs(out - ref)))
    assert err < 5e-2, f"max abs error {err}"
    print("KERNEL_OK")
</pallas_src>

<mosaic_0001>
module attributes {stable_mosaic.version = 11 : i64} {
  func.func @_fused_dense_layer_kernel(%arg0: i32, %arg1: memref<2x18x128xf32, #tpu.memory_space<vmem>>, %arg2: memref<384x128xf32, #tpu.memory_space<vmem>>, %arg3: memref<1x128xf32, #tpu.memory_space<vmem>>, %arg4: memref<2x128xf32, #tpu.memory_space<vmem>>, %arg5: memref<128x128xf32, #tpu.memory_space<vmem>>, %arg6: memref<2x16x128xf32, #tpu.memory_space<vmem>>) attributes {dimension_semantics = [#tpu.dimension_semantics<arbitrary>], iteration_bounds = array<i64: 1>, scalar_prefetch = 0 : i64, scratch_operands = 0 : i64, tpu.core_type = #tpu.core_type<tc>, window_params = [{pipeline_mode = #tpu.pipeline_mode<synchronous>, transform_indices = @transform_0, window_bounds = array<i64: 2, 18, 128>}, {pipeline_mode = #tpu.pipeline_mode<synchronous>, transform_indices = @transform_1, window_bounds = array<i64: 384, 128>}, {pipeline_mode = #tpu.pipeline_mode<synchronous>, transform_indices = @transform_2, window_bounds = array<i64: 1, 128>}, {pipeline_mode = #tpu.pipeline_mode<synchronous>, transform_indices = @transform_3, window_bounds = array<i64: 2, 128>}, {pipeline_mode = #tpu.pipeline_mode<synchronous>, transform_indices = @transform_4, window_bounds = array<i64: 128, 128>}, {pipeline_mode = #tpu.pipeline_mode<synchronous>, transform_indices = @transform_5, window_bounds = array<i64: 2, 16, 128>}]} {
    %c0 = arith.constant 0 : index
    %c0_0 = arith.constant 0 : index
    %c0_1 = arith.constant 0 : index
    %0 = vector.load %arg1[%c0, %c0_0, %c0_1] : memref<2x18x128xf32, #tpu.memory_space<vmem>>, vector<2x16x128xf32>
    %1 = vector.shape_cast %0 : vector<2x16x128xf32> to vector<32x128xf32>
    %c0_2 = arith.constant 0 : index
    %c1 = arith.constant 1 : index
    %c0_3 = arith.constant 0 : index
    %2 = vector.load %arg1[%c0_2, %c1, %c0_3] : memref<2x18x128xf32, #tpu.memory_space<vmem>>, vector<2x16x128xf32>
    %3 = vector.shape_cast %2 : vector<2x16x128xf32> to vector<32x128xf32>
    %c0_4 = arith.constant 0 : index
    %c2 = arith.constant 2 : index
    %c0_5 = arith.constant 0 : index
    %4 = vector.load %arg1[%c0_4, %c2, %c0_5] : memref<2x18x128xf32, #tpu.memory_space<vmem>>, vector<2x16x128xf32>
    %5 = vector.shape_cast %4 : vector<2x16x128xf32> to vector<32x128xf32>
    %6 = tpu.concatenate %1, %3, %5 in 1 : vector<32x128xf32>, vector<32x128xf32>, vector<32x128xf32> -> vector<32x384xf32>
    %c0_6 = arith.constant 0 : index
    %c0_7 = arith.constant 0 : index
    %7 = vector.load %arg2[%c0_6, %c0_7] : memref<384x128xf32, #tpu.memory_space<vmem>>, vector<384x128xf32>
    %cst = arith.constant dense<0.000000e+00> : vector<32x128xf32>
    %8 = tpu.matmul %6, %7, %cst {dimension_numbers = #tpu.dot_dimension_numbers<[1], [0], [0], [1], [0, 0, 1, 1], [], []>} : vector<32x384xf32>, vector<384x128xf32>, vector<32x128xf32> -> vector<32x128xf32>
    %c0_8 = arith.constant 0 : index
    %c0_9 = arith.constant 0 : index
    %9 = vector.load %arg3[%c0_8, %c0_9] : memref<1x128xf32, #tpu.memory_space<vmem>>, vector<1x128xf32>
    %10 = vector.broadcast %9 : vector<1x128xf32> to vector<32x128xf32>
    %11 = arith.addf %8, %10 : vector<32x128xf32>
    %cst_10 = arith.constant 0.000000e+00 : f32
    %12 = vector.broadcast %cst_10 : f32 to vector<32x128xf32>
    %13 = arith.maximumf %11, %12 : vector<32x128xf32>
    %cst_11 = arith.constant dense<0.000000e+00> : vector<128xf32>
    %14 = vector.multi_reduction <add>, %13, %cst_11 [0] : vector<32x128xf32> to vector<128xf32>
    %15 = vector.shape_cast %14 : vector<128xf32> to vector<1x128xf32>
    %c0_12 = arith.constant 0 : index
    %c0_13 = arith.constant 0 : index
    %16 = vector.load %arg5[%c0_12, %c0_13] : memref<128x128xf32, #tpu.memory_space<vmem>>, vector<128x128xf32>
    %cst_14 = arith.constant dense<0.000000e+00> : vector<1x128xf32>
    %17 = tpu.matmul %15, %16, %cst_14 {dimension_numbers = #tpu.dot_dimension_numbers<[1], [0], [0], [1], [0, 0, 1, 1], [], []>} : vector<1x128xf32>, vector<128x128xf32>, vector<1x128xf32> -> vector<1x128xf32>
    %cst_15 = arith.constant 0.001953125 : f32
    %18 = vector.broadcast %cst_15 : f32 to vector<1x128xf32>
    %19 = arith.mulf %17, %18 : vector<1x128xf32>
    %20 = vector.broadcast %19 : vector<1x128xf32> to vector<32x128xf32>
    %21 = arith.subf %13, %20 : vector<32x128xf32>
    %22 = arith.mulf %21, %21 : vector<32x128xf32>
    %cst_16 = arith.constant dense<0.000000e+00> : vector<128xf32>
    %23 = vector.multi_reduction <add>, %22, %cst_16 [0] : vector<32x128xf32> to vector<128xf32>
    %24 = vector.shape_cast %23 : vector<128xf32> to vector<1x128xf32>
    %c0_17 = arith.constant 0 : index
    %c0_18 = arith.constant 0 : index
    %25 = vector.load %arg5[%c0_17, %c0_18] : memref<128x128xf32, #tpu.memory_space<vmem>>, vector<128x128xf32>
    %cst_19 = arith.constant dense<0.000000e+00> : vector<1x128xf32>
    %26 = tpu.matmul %24, %25, %cst_19 {dimension_numbers = #tpu.dot_dimension_numbers<[1], [0], [0], [1], [0, 0, 1, 1], [], []>} : vector<1x128xf32>, vector<128x128xf32>, vector<1x128xf32> -> vector<1x128xf32>
    %cst_20 = arith.constant 0.001953125 : f32
    %27 = vector.broadcast %cst_20 : f32 to vector<1x128xf32>
    %28 = arith.mulf %26, %27 : vector<1x128xf32>
    %cst_21 = arith.constant 9.99999974E-6 : f32
    %29 = vector.broadcast %cst_21 : f32 to vector<1x128xf32>
    %30 = arith.addf %28, %29 : vector<1x128xf32>
    %31 = math.rsqrt %30 : vector<1x128xf32>
    %c0_22 = arith.constant 0 : index
    %c0_23 = arith.constant 0 : index
    %32 = vector.load %arg4[%c0_22, %c0_23] : memref<2x128xf32, #tpu.memory_space<vmem>>, vector<1x128xf32>
    %33 = arith.mulf %32, %31 : vector<1x128xf32>
    %34 = vector.broadcast %33 : vector<1x128xf32> to vector<32x128xf32>
    %35 = arith.mulf %21, %34 : vector<32x128xf32>
    %c1_24 = arith.constant 1 : index
    %c0_25 = arith.constant 0 : index
    %36 = vector.load %arg4[%c1_24, %c0_25] : memref<2x128xf32, #tpu.memory_space<vmem>>, vector<1x128xf32>
    %37 = vector.broadcast %36 : vector<1x128xf32> to vector<32x128xf32>
    %38 = arith.addf %35, %37 : vector<32x128xf32>
    %39 = vector.shape_cast %38 : vector<32x128xf32> to vector<2x16x128xf32>
    %c0_26 = arith.constant 0 : index
    %c0_27 = arith.constant 0 : index
    %c0_28 = arith.constant 0 : index
    %40 = vector.load %arg6[%c0_26, %c0_27, %c0_28] : memref<2x16x128xf32, #tpu.memory_space<vmem>>, vector<2x16x128xf32>
    tpu.vector_store %arg6[%c0_26, %c0_27, %c0_28], %39 {strides = array<i32>} : memref<2x16x128xf32, #tpu.memory_space<vmem>>, vector<2x16x128xf32>,
    return
  }
  func.func @transform_0(%arg0: i32) -> (i32, i32, i32) {
    %c0_i32 = arith.constant 0 : i32
    %c0_i32_0 = arith.constant 0 : i32
    %c0_i32_1 = arith.constant 0 : i32
    %c0_i32_2 = arith.constant 0 : i32
    return %c0_i32, %c0_i32_0, %c0_i32_1 : i32, i32, i32
  }
  func.func @transform_1(%arg0: i32) -> (i32, i32) {
    %c0_i32 = arith.constant 0 : i32
    %c0_i32_0 = arith.constant 0 : i32
    %c0_i32_1 = arith.constant 0 : i32
    return %c0_i32, %c0_i32_0 : i32, i32
  }
  func.func @transform_2(%arg0: i32) -> (i32, i32) {
    %c0_i32 = arith.constant 0 : i32
    %c0_i32_0 = arith.constant 0 : i32
    %c0_i32_1 = arith.constant 0 : i32
    return %c0_i32, %c0_i32_0 : i32, i32
  }
  func.func @transform_3(%arg0: i32) -> (i32, i32) {
    %c0_i32 = arith.constant 0 : i32
    %c0_i32_0 = arith.constant 0 : i32
    %c0_i32_1 = arith.constant 0 : i32
    return %c0_i32, %c0_i32_0 : i32, i32
  }
  func.func @transform_4(%arg0: i32) -> (i32, i32) {
    %c0_i32 = arith.constant 0 : i32
    %c0_i32_0 = arith.constant 0 : i32
    %c0_i32_1 = arith.constant 0 : i32
    return %c0_i32, %c0_i32_0 : i32, i32
  }
  func.func @transform_5(%arg0: i32) -> (i32, i32, i32) {
    %c0_i32 = arith.constant 0 : i32
    %c0_i32_0 = arith.constant 0 : i32
    %c0_i32_1 = arith.constant 0 : i32
    %c0_i32_2 = arith.constant 0 : i32
    return %c0_i32, %c0_i32_0, %c0_i32_1 : i32, i32, i32
  }
}

</mosaic_0001>

<bundles_post_ra>
// kernel: tile.23
= control target key start
LH: loop header
LB: loop body
LE: loop exit
PB: predicated region body
PF: predicated region fallthrough
CT: control target
= control target key end

     0   :  { %s28_s0 = inlined_call_operand.vmem [shape: f32[8], index: 0, kind: input, shape index: {}]   ;;  %s29_s1 = inlined_call_operand.vmem [shape: f32[16,8], index: 1, kind: output, shape index: {}]  }
   0x1   :  { %v4_v0 = vld [vmem:[%s28_s0] ss:$0 sm:$0xff] }
   0x2   :  { %5 = vst [vmem:[%s29_s1] sm:$0xff] %v4_v0 }
   0x3   :  { %8 = vst [vmem:[%s29_s1 + $0x8] sm:$0xff] %v4_v0 }

// kernel: tile.28
= control target key start
LH: loop header
LB: loop body
LE: loop exit
PB: predicated region body
PF: predicated region fallthrough
CT: control target
= control target key end

     0   :  { %s131_s10 = smov 120   ;;  %s132_s11 = smov 104   ;;  %vm3_vm0 = vcmask 64512   ;;  %vm9_vm1 = vcmask 1048512   ;;  %vm15_vm2 = vcmask 982912   ;;  %vm21_vm3 = vcmask 917312   ;;  %s207_s0 = inlined_call_operand.vmem [shape: f32[16,8], index: 0, kind: input, shape index: {}]   ;;  %s208_s1 = inlined_call_operand.vmem [shape: f32[1,128], index: 1, kind: output, shape index: {}]  }
   0x1   :  { %v101_v0 = vld [vmem:[%s207_s0 + $0xf] sm:$0x1]   ;;  %v103_v1 = vld [vmem:[%s207_s0 + $0xd] sm:$0x1]   ;;  %v105_v2 = vld [vmem:[%s207_s0 + $0xb] sm:$0x1]  }
   0x2   :  { %7 = vrot.lane.b32.xlu0 %v101_v0, %s131_s10  ;;  %19 = vrot.lane.b32.xlu1 %v103_v1, %s132_s11  ;;  %s133_s14 = smov 88   ;;  %v102_v3 = vld [vmem:[%s207_s0 + $0xe] sm:$0x1]   ;;  %v104_v4 = vld [vmem:[%s207_s0 + $0xc] sm:$0x1]   ;;  %s134_s19 = smov 112  }
   0x3   :  { %31 = vrot.lane.b32.xlu2 %v105_v2, %s133_s14  ;;  %s135_s20 = smov 96   ;;  %v106_v5 = vld [vmem:[%s207_s0 + $0xa] sm:$0x1]   ;;  %s136_s23 = smov 80   ;;  %v107_v6 = vld [vmem:[%s207_s0 + $0x9] sm:$0x1]  }
   0x4   :  { %v108_v7 = vld [vmem:[%s207_s0 + $0x8] sm:$0x1]   ;;  %s137_s28 = smov 72   ;;  %s138_s29 = smov 64   ;;  %v109_v8 = vld [vmem:[%s207_s0 + $0x7] sm:$0x1]  }
   0x5   :  { %s139_s3 = smov 56   ;;  %v110_v9 = vld [vmem:[%s207_s0 + $0x6] sm:$0x1]   ;;  %v111_v10 = vld [vmem:[%s207_s0 + $0x5] sm:$0x1]   ;;  %s140_s8 = smov 48  }
   0x6   :  { %s141_s9 = smov 40   ;;  %v112_v11 = vld [vmem:[%s207_s0 + $0x4] sm:$0x1]   ;;  %s142_s12 = smov 32   ;;  %v113_v12 = vld [vmem:[%s207_s0 + $0x3] sm:$0x1]  }
   0x7   :  { %v114_v13 = vld [vmem:[%s207_s0 + $0x2] sm:$0x1]   ;;  %s143_s17 = smov 24   ;;  %s144_s18 = smov 16   ;;  %v115_v14 = vld [vmem:[%s207_s0 + $0x1] sm:$0x1]  }
   0x8   :  { %s145_s21 = smov 8   ;;  %v2_v15 = vld [vmem:[%s207_s0] sm:$0x1]   ;;  %vm27_vm4 = vcmask 851712   ;;  %vm33_vm5 = vcmask 786112   ;;  %vm39_vm6 = vcmask 720512  }
   0x9   :  { %4 = vst.msk [vmem:[#allocation0] sm:$0x1] %vm3_vm0, %v2_v15   ;;  %vm45_vm7 = vcmask 654912   ;;  %vm51_vm8 = vcmask 589312   ;;  %vm57_vm9 = vcmask 523712   ;;  %vm63_vm10 = vcmask 458112  }
   0xa   :  { %13 = vrot.lane.b32.xlu0 %v102_v3, %s134_s19  ;;  %25 = vrot.lane.b32.xlu1 %v104_v4, %s135_s20  ;;  %vm69_vm11 = vcmask 392512   ;;  %vm75_vm12 = vcmask 326912   ;;  %vm81_vm13 = vcmask 261312   ;;  %vm87_vm14 = vcmask 195712  }
   0xb   :  { %37 = vrot.lane.b32.xlu2 %v106_v5, %s136_s23  ;;  %vm93_vm15 = vcmask 130112  }
  0x12   :  { %43 = vrot.lane.b32.xlu0 %v107_v6, %s137_s28  ;;  %49 = vrot.lane.b32.xlu1 %v108_v7, %s138_s29 }
  0x13   :  { %55 = vrot.lane.b32.xlu2 %v109_v8, %s139_s3 }
  0x1a   :  { %61 = vrot.lane.b32.xlu0 %v110_v9, %s140_s8  ;;  %67 = vrot.lane.b32.xlu1 %v111_v10, %s141_s9 }
  0x1b   :  { %73 = vrot.lane.b32.xlu2 %v112_v11, %s142_s12 }
  0x22   :  { %79 = vrot.lane.b32.xlu0 %v113_v12, %s143_s17  ;;  %85 = vrot.lane.b32.xlu1 %v114_v13, %s144_s18 }
  0x23   :  { %91 = vrot.lane.b32.xlu2 %v115_v14, %s145_s21 }
  0x5d   :  { %v32_v16 = vpop.permute.xlu2 %31  }
  0x65   :  { %v38_v17 = vpop.permute.xlu2 %37  }
  0x6d   :  { %v56_v18 = vpop.permute.xlu2 %55  }
  0x74   :  { %v8_v19 = vpop.permute.xlu0 %7   ;;  %v20_v20 = vpop.permute.xlu1 %19  }
  0x75   :  { %10 = vst.msk [vmem:[#allocation0] sm:$0x1] %vm9_vm1, %v8_v19   ;;  %v74_v21 = vpop.permute.xlu2 %73  }
  0x7c   :  { %v14_v22 = vpop.permute.xlu0 %13   ;;  %v26_v23 = vpop.permute.xlu1 %25  }
  0x7d   :  { %16 = vst.msk [vmem:[#allocation0] sm:$0x1] %vm15_vm2, %v14_v22   ;;  %v92_v24 = vpop.permute.xlu2 %91  }
  0x7e   :  { %22 = vst.msk [vmem:[#allocation0] sm:$0x1] %vm21_vm3, %v20_v20  }
  0x7f   :  { %28 = vst.msk [vmem:[#allocation0] sm:$0x1] %vm27_vm4, %v26_v23  }
  0x80   :  { %34 = vst.msk [vmem:[#allocation0] sm:$0x1] %vm33_vm5, %v32_v16  }
  0x81   :  { %40 = vst.msk [vmem:[#allocation0] sm:$0x1] %vm39_vm6, %v38_v17  }
  0x84   :  { %v44_v25 = vpop.permute.xlu0 %43   ;;  %v50_v26 = vpop.permute.xlu1 %49  }
  0x85   :  { %46 = vst.msk [vmem:[#allocation0] sm:$0x1] %vm45_vm7, %v44_v25  }
  0x86   :  { %52 = vst.msk [vmem:[#allocation0] sm:$0x1] %vm51_vm8, %v50_v26  }
  0x87   :  { %58 = vst.msk [vmem:[#allocation0] sm:$0x1] %vm57_vm9, %v56_v18  }
  0x8c   :  { %v62_v27 = vpop.permute.xlu0 %61   ;;  %v68_v28 = vpop.permute.xlu1 %67  }
  0x8d   :  { %64 = vst.msk [vmem:[#allocation0] sm:$0x1] %vm63_vm10, %v62_v27  }
  0x8e   :  { %70 = vst.msk [vmem:[#allocation0] sm:$0x1] %vm69_vm11, %v68_v28  }
  0x8f   :  { %76 = vst.msk [vmem:[#allocation0] sm:$0x1] %vm75_vm12, %v74_v21  }
  0x94   :  { %v80_v29 = vpop.permute.xlu0 %79   ;;  %v86_v30 = vpop.permute.xlu1 %85  }
  0x95   :  { %82 = vst.msk [vmem:[#allocation0] sm:$0x1] %vm81_vm13, %v80_v29  }
  0x96   :  { %88 = vst.msk [vmem:[#allocation0] sm:$0x1] %vm87_vm14, %v86_v30  }
  0x97   :  { %94 = vst.msk [vmem:[#allocation0] sm:$0x1] %vm93_vm15, %v92_v24  }
  0x9e   :  { %v97_v31 = vld [vmem:[#allocation0] sm:$0x1] }
  0x9f   :  { %100 = vst [vmem:[%s208_s1] sm:$0x1] %v97_v31 }

// kernel: dense_layer_forward.1
= control target key start
LH: loop header
LB: loop body
LE: loop exit
PB: predicated region body
PF: predicated region fallthrough
CT: control target
= control target key end

     0   :  { %s575_s1 = inlined_call_operand.vmem [shape: f32[384,128], index: 1, kind: input, shape index: {}]   ;;  %s576_s2 = inlined_call_operand.vmem [shape: f32[1,128], index: 2, kind: input, shape index: {}]   ;;  %s577_s0 = inlined_call_operand.vmem [shape: f32[2,18,128], index: 0, kind: input, shape index: {}]   ;;  %s578_s4 = inlined_call_operand.vmem [shape: f32[128,128], index: 4, kind: input, shape index: {}]   ;;  %s579_s3 = inlined_call_operand.vmem [shape: f32[2,128], index: 3, kind: input, shape index: {}]   ;;  %s580_s5 = inlined_call_operand.vmem [shape: f32[2,16,128], index: 5, kind: output, shape index: {}]  }
   0x1   :  { %v79_v0 = vld [vmem:[%s575_s1 + $0x178] sm:$0xff]  ;;  %v78_v2 = vld [vmem:[%s575_s1 + $0x170] sm:$0xff]  ;;  %v77_v5 = vld [vmem:[%s575_s1 + $0x168] sm:$0xff] }
   0x2   :  { %v47_v1 = vld [vmem:[%s575_s1 + $0x78] sm:$0xff]  ;;  %142 = vmatpush.msra.mxu2 %v79_v0  ;;  %v46_v3 = vld [vmem:[%s575_s1 + $0x70] sm:$0xff]  ;;  %v45_v6 = vld [vmem:[%s575_s1 + $0x68] sm:$0xff] }
   0x3   :  { %84 = vmatpush.msra.mxu0 %v47_v1  ;;  %v63_v4 = vld [vmem:[%s575_s1 + $0xf8] sm:$0xff]  ;;  %v62_v7 = vld [vmem:[%s575_s1 + $0xf0] sm:$0xff]  ;;  %v61_v8 = vld [vmem:[%s575_s1 + $0xe8] sm:$0xff] }
   0x4   :  { %113 = vmatpush.msra.mxu1 %v63_v4  ;;  %143 = vmatpush.msra.mxu2 %v78_v2  ;;  %v76_v9 = vld [vmem:[%s575_s1 + $0x160] sm:$0xff]  ;;  %v75_v12 = vld [vmem:[%s575_s1 + $0x158] sm:$0xff]  ;;  %v74_v15 = vld [vmem:[%s575_s1 + $0x150] sm:$0xff] }
   0x5   :  { %85 = vmatpush.msra.mxu0 %v46_v3  ;;  %v44_v10 = vld [vmem:[%s575_s1 + $0x60] sm:$0xff]  ;;  %v43_v13 = vld [vmem:[%s575_s1 + $0x58] sm:$0xff]  ;;  %v42_v16 = vld [vmem:[%s575_s1 + $0x50] sm:$0xff] }
   0x6   :  { %114 = vmatpush.msra.mxu1 %v62_v7  ;;  %144 = vmatpush.msra.mxu2 %v77_v5  ;;  %v60_v11 = vld [vmem:[%s575_s1 + $0xe0] sm:$0xff]  ;;  %v59_v14 = vld [vmem:[%s575_s1 + $0xd8] sm:$0xff]  ;;  %v58_v17 = vld [vmem:[%s575_s1 + $0xd0] sm:$0xff] }
   0x7   :  { %86 = vmatpush.msra.mxu0 %v45_v6  ;;  %v73_v18 = vld [vmem:[%s575_s1 + $0x148] sm:$0xff]  ;;  %v72_v21 = vld [vmem:[%s575_s1 + $0x140] sm:$0xff]  ;;  %v71_v24 = vld [vmem:[%s575_s1 + $0x138] sm:$0xff] }
   0x8   :  { %115 = vmatpush.msra.mxu1 %v61_v8  ;;  %145 = vmatpush.msra.mxu2 %v76_v9  ;;  %v41_v19 = vld [vmem:[%s575_s1 + $0x48] sm:$0xff]  ;;  %v40_v22 = vld [vmem:[%s575_s1 + $0x40] sm:$0xff]  ;;  %v39_v25 = vld [vmem:[%s575_s1 + $0x38] sm:$0xff] }
   0x9   :  { %87 = vmatpush.msra.mxu0 %v44_v10  ;;  %v57_v20 = vld [vmem:[%s575_s1 + $0xc8] sm:$0xff]  ;;  %v56_v23 = vld [vmem:[%s575_s1 + $0xc0] sm:$0xff]  ;;  %v55_v26 = vld [vmem:[%s575_s1 + $0xb8] sm:$0xff] }
   0xa   :  { %116 = vmatpush.msra.mxu1 %v60_v11  ;;  %146 = vmatpush.msra.mxu2 %v75_v12  ;;  %v70_v27 = vld [vmem:[%s575_s1 + $0x130] sm:$0xff]  ;;  %v69_v30 = vld [vmem:[%s575_s1 + $0x128] sm:$0xff]  ;;  %v68_v33 = vld [vmem:[%s575_s1 + $0x120] sm:$0xff] }
   0xb   :  { %88 = vmatpush.msra.mxu0 %v43_v13  ;;  %v38_v28 = vld [vmem:[%s575_s1 + $0x30] sm:$0xff]  ;;  %v37_v31 = vld [vmem:[%s575_s1 + $0x28] sm:$0xff]  ;;  %v36_v34 = vld [vmem:[%s575_s1 + $0x20] sm:$0xff] }
   0xc   :  { %117 = vmatpush.msra.mxu1 %v59_v14  ;;  %147 = vmatpush.msra.mxu2 %v74_v15  ;;  %v54_v29 = vld [vmem:[%s575_s1 + $0xb0] sm:$0xff]  ;;  %v53_v32 = vld [vmem:[%s575_s1 + $0xa8] sm:$0xff]  ;;  %v52_v35 = vld [vmem:[%s575_s1 + $0xa0] sm:$0xff] }
   0xd   :  { %89 = vmatpush.msra.mxu0 %v42_v16  ;;  %v67_v36 = vld [vmem:[%s575_s1 + $0x118] sm:$0xff]  ;;  %v66_v39 = vld [vmem:[%s575_s1 + $0x110] sm:$0xff]  ;;  %v65_v42 = vld [vmem:[%s575_s1 + $0x108] sm:$0xff] }
   0xe   :  { %118 = vmatpush.msra.mxu1 %v58_v17  ;;  %148 = vmatpush.msra.mxu2 %v73_v18  ;;  %v35_v37 = vld [vmem:[%s575_s1 + $0x18] sm:$0xff]  ;;  %v34_v40 = vld [vmem:[%s575_s1 + $0x10] sm:$0xff]  ;;  %v33_v43 = vld [vmem:[%s575_s1 + $0x8] sm:$0xff] }
   0xf   :  { %90 = vmatpush.msra.mxu0 %v41_v19  ;;  %v51_v38 = vld [vmem:[%s575_s1 + $0x98] sm:$0xff]  ;;  %v50_v41 = vld [vmem:[%s575_s1 + $0x90] sm:$0xff]  ;;  %v49_v44 = vld [vmem:[%s575_s1 + $0x88] sm:$0xff] }
  0x10   :  { %119 = vmatpush.msra.mxu1 %v57_v20  ;;  %149 = vmatpush.msra.mxu2 %v72_v21  ;;  %v64_v45 = vld [vmem:[%s575_s1 + $0x100] sm:$0xff]  ;;  %v29_v51 = vld [vmem:[%s577_s0 + $0xa] sm:$0xff]  ;;  %v22_v55 = vld [vmem:[%s577_s0 + $0x18] sm:$0xff] }
  0x11   :  { %91 = vmatpush.msra.mxu0 %v40_v22  ;;  %v32_v46 = vld [vmem:[%s575_s1] sm:$0xff]  ;;  %v21_v52 = vld [vmem:[%s577_s0 + $0x8] sm:$0xff]  ;;  %v199_v60 = vld [vmem:[%s578_s4 + $0x78] sm:$0xff] }
  0x12   :  { %120 = vmatpush.msra.mxu1 %v56_v23  ;;  %150 = vmatpush.msra.mxu2 %v71_v24  ;;  %v28_v47 = vld [vmem:[%s577_s0 + $0x2] sm:$0xff]  ;;  %v30_v54 = vld [vmem:[%s577_s0 + $0x1a] sm:$0xff]  ;;  %v198_v61 = vld [vmem:[%s578_s4 + $0x70] sm:$0xff] }
  0x13   :  { %92 = vmatpush.msra.mxu0 %v39_v25  ;;  %v20_v48 = vld [vmem:[%s577_s0] sm:$0xff]  ;;  %v25_v53 = vld [vmem:[%s577_s0 + $0x9] sm:$0xff]  ;;  %200 = vmatpush.msra.mxu3 %v199_v60  ;;  %v195_v0 = vld [vmem:[%s578_s4 + $0x58] sm:$0xff] }
  0x14   :  { %121 = vmatpush.msra.mxu1 %v55_v26  ;;  %151 = vmatpush.msra.mxu2 %v70_v27  ;;  %v48_v49 = vld [vmem:[%s575_s1 + $0x80] sm:$0xff]  ;;  %v197_v62 = vld [vmem:[%s578_s4 + $0x68] sm:$0xff]  ;;  %v194_v1 = vld [vmem:[%s578_s4 + $0x50] sm:$0xff] }
  0x15   :  { %93 = vmatpush.msra.mxu0 %v38_v28  ;;  %v24_v50 = vld [vmem:[%s577_s0 + $0x1] sm:$0xff]  ;;  %v26_v56 = vld [vmem:[%s577_s0 + $0x19] sm:$0xff]  ;;  %201 = vmatpush.msra.mxu3 %v198_v61  ;;  %v190_v7 = vld [vmem:[%s578_s4 + $0x30] sm:$0xff] }
  0x16   :  { %122 = vmatpush.msra.mxu1 %v54_v29  ;;  %152 = vmatpush.msra.mxu2 %v69_v30  ;;  %v31_v57 = vld [vmem:[%s577_s0 + $0x22] sm:$0xff]  ;;  %v191_v5 = vld [vmem:[%s578_s4 + $0x38] sm:$0xff]  ;;  %v186_v13 = vld [vmem:[%s578_s4 + $0x10] sm:$0xff] }
  0x17   :  { %94 = vmatpush.msra.mxu0 %v37_v31  ;;  %v23_v58 = vld [vmem:[%s577_s0 + $0x20] sm:$0xff]  ;;  %202 = vmatpush.msra.mxu3 %v197_v62  ;;  %v193_v2 = vld [vmem:[%s578_s4 + $0x48] sm:$0xff]  ;;  %v187_v11 = vld [vmem:[%s578_s4 + $0x18] sm:$0xff] }
  0x18   :  { %123 = vmatpush.msra.mxu1 %v53_v32  ;;  %153 = vmatpush.msra.mxu2 %v68_v33  ;;  %v27_v59 = vld [vmem:[%s577_s0 + $0x21] sm:$0xff]  ;;  %v292_v16 = vld [vmem:[%s576_s2] ss:$0 sm:$0xff] }
  0x19   :  { %95 = vmatpush.msra.mxu0 %v36_v34  ;;  %v196_v63 = vld [vmem:[%s578_s4 + $0x60] sm:$0xff]  ;;  %v189_v8 = vld [vmem:[%s578_s4 + $0x28] sm:$0xff] }
  0x1a   :  { %124 = vmatpush.msra.mxu1 %v52_v35  ;;  %154 = vmatpush.msra.mxu2 %v67_v36  ;;  %v192_v3 = vld [vmem:[%s578_s4 + $0x40] sm:$0xff]  ;;  %v185_v15 = vld [vmem:[%s578_s4 + $0x8] sm:$0xff] }
  0x1b   :  { %96 = vmatpush.msra.mxu0 %v35_v37  ;;  %203 = vmatpush.msra.mxu3 %v196_v63  ;;  %v188_v10 = vld [vmem:[%s578_s4 + $0x20] sm:$0xff] }
  0x1c   :  { %125 = vmatpush.msra.mxu1 %v51_v38  ;;  %155 = vmatpush.msra.mxu2 %v66_v39  ;;  %v184_v17 = vld [vmem:[%s578_s4] sm:$0xff] }
  0x1d   :  { %97 = vmatpush.msra.mxu0 %v34_v40  ;;  %204 = vmatpush.msra.mxu3 %v195_v0 }
  0x1e   :  { %126 = vmatpush.msra.mxu1 %v50_v41  ;;  %156 = vmatpush.msra.mxu2 %v65_v42 }
  0x1f   :  { %98 = vmatpush.msra.mxu0 %v33_v43  ;;  %205 = vmatpush.msra.mxu3 %v194_v1 }
  0x20   :  { %127 = vmatpush.msra.mxu1 %v49_v44  ;;  %157 = vmatpush.msra.mxu2 %v64_v45 }
  0x21   :  { %99 = vmatpush.msra.mxu0 %v32_v46  ;;  %158 = vmatmul.f32.vlgmr.msra.gmra.mxu2 %v28_v47 }
  0x22   :  { %100 = vmatmul.f32.vlgmr.msra.gmra.mxu0 %v20_v48  ;;  %128 = vmatpush.msra.mxu1 %v48_v49 }
  0x23   :  { %129 = vmatmul.f32.vlgmr.msra.gmra.mxu1 %v24_v50  ;;  %239 = vmatpush.msrb.mxu0 %v199_v60 }
  0x24   :  { %206 = vmatpush.msra.mxu3 %v193_v2 }
  0x25   :  { %240 = vmatpush.msrb.mxu0 %v198_v61 }
  0x26   :  { %207 = vmatpush.msra.mxu3 %v192_v3 }
  0x27   :  { %241 = vmatpush.msrb.mxu0 %v197_v62 }
  0x28   :  { %208 = vmatpush.msra.mxu3 %v191_v5 }
  0x29   :  { %161 = vmatmul.f32.gmra.mxu2 %v29_v51  ;;  %242 = vmatpush.msrb.mxu0 %v196_v63 }
  0x2a   :  { %103 = vmatmul.f32.gmra.mxu0 %v21_v52  ;;  %209 = vmatpush.msra.mxu3 %v190_v7 }
  0x2b   :  { %132 = vmatmul.f32.gmra.mxu1 %v25_v53  ;;  %243 = vmatpush.msrb.mxu0 %v195_v0 }
  0x2c   :  { %210 = vmatpush.msra.mxu3 %v189_v8 }
  0x2d   :  { %244 = vmatpush.msrb.mxu0 %v194_v1 }
  0x2e   :  { %211 = vmatpush.msra.mxu3 %v188_v10 }
  0x2f   :  { %245 = vmatpush.msrb.mxu0 %v193_v2 }
  0x30   :  { %212 = vmatpush.msra.mxu3 %v187_v11 }
  0x31   :  { %164 = vmatmul.f32.gmra.mxu2 %v30_v54  ;;  %246 = vmatpush.msrb.mxu0 %v192_v3 }
  0x32   :  { %106 = vmatmul.f32.gmra.mxu0 %v22_v55  ;;  %213 = vmatpush.msra.mxu3 %v186_v13 }
  0x33   :  { %135 = vmatmul.f32.gmra.mxu1 %v26_v56  ;;  %247 = vmatpush.msrb.mxu0 %v191_v5 }
  0x34   :  { %214 = vmatpush.msra.mxu3 %v185_v15 }
  0x35   :  { %248 = vmatpush.msrb.mxu0 %v190_v7 }
  0x36   :  { %215 = vmatpush.msra.mxu3 %v184_v17 }
  0x37   :  { %249 = vmatpush.msrb.mxu0 %v189_v8 }
  0x39   :  { %167 = vmatmul.f32.gmra.mxu2 %v31_v57  ;;  %250 = vmatpush.msrb.mxu0 %v188_v10 }
  0x3a   :  { %109 = vmatmul.f32.gmra.mxu0 %v23_v58 }
  0x3b   :  { %138 = vmatmul.f32.gmra.mxu1 %v27_v59  ;;  %251 = vmatpush.msrb.mxu0 %v187_v11 }
  0x3d   :  { %252 = vmatpush.msrb.mxu0 %v186_v13 }
  0x3f   :  { %253 = vmatpush.msrb.mxu0 %v185_v15  ;;  %v271_v15 = vld [vmem:[%s579_s3] sm:$0x1] }
  0x41   :  { %254 = vmatpush.msrb.mxu0 %v184_v17 }
  0x9f   :  { %v101_v4 = vpop.f32.mrf.mxu0 }
  0xa0   :  { %v130_v6 = vpop.f32.mrf.mxu1  ;;  %v102_v21 = vadd.f32 %v292_v16, %v101_v4 }
  0xa2   :  { %v131_v25 = vadd.f32 %v130_v6, %v102_v21 }
  0xa4   :  { %v159_v9 = vpop.f32.mrf.mxu2 }
  0xa5   :  { %v160_v30 = vadd.f32 %v159_v9, %v131_v25 }
  0xa7   :  { %v104_v12 = vpop.f32.mrf.mxu0  ;;  %v171_v36 = vmax.f32 %v160_v30, 0.0 }
  0xa8   :  { %v133_v14 = vpop.f32.mrf.mxu1  ;;  %v105_v19 = vadd.f32 %v292_v16, %v104_v12 }
  0xaa   :  { %v134_v24 = vadd.f32 %v133_v14, %v105_v19  ;;  %v293_v19 = vld [vmem:[%s579_s3 + $0x1] ss:$0 sm:$0xff] }
  0xac   :  { %v162_v18 = vpop.f32.mrf.mxu2 }
  0xad   :  { %v163_v28 = vadd.f32 %v162_v18, %v134_v24 }
  0xaf   :  { %v107_v20 = vpop.f32.mrf.mxu0  ;;  %v172_v34 = vmax.f32 %v163_v28, 0.0 }
  0xb0   :  { %v108_v22 = vadd.f32 %v292_v16, %v107_v20  ;;  %v136_v23 = vpop.f32.mrf.mxu1 }
  0xb1   :  { %v175_v39 = vadd.f32 %v172_v34, %v171_v36 }
  0xb2   :  { %v137_v26 = vadd.f32 %v136_v23, %v108_v22 }
  0xb4   :  { %v165_v27 = vpop.f32.mrf.mxu2 }
  0xb5   :  { %v166_v31 = vadd.f32 %v165_v27, %v137_v26 }
  0xb7   :  { %v110_v29 = vpop.f32.mrf.mxu0  ;;  %v173_v37 = vmax.f32 %v166_v31, 0.0 }
  0xb8   :  { %v111_v32 = vadd.f32 %v292_v16, %v110_v29  ;;  %v139_v33 = vpop.f32.mrf.mxu1 }
  0xb9   :  { %v176_v41 = vadd.f32 %v175_v39, %v173_v37 }
  0xba   :  { %v140_v35 = vadd.f32 %v139_v33, %v111_v32 }
  0xbc   :  { %v168_v38 = vpop.f32.mrf.mxu2 }
  0xbd   :  { %v169_v40 = vadd.f32 %v168_v38, %v140_v35 }
  0xbf   :  { %v174_v42 = vmax.f32 %v169_v40, 0.0 }
  0xc1   :  { %v177_v43 = vadd.f32 %v176_v41, %v174_v42 }
  0xc3   :  { %v178_v44 = vrot.slane %v177_v43, 4 }
  0xc5   :  { %v179_v45 = vadd.f32 %v178_v44, %v177_v43 }
  0xc7   :  { %v180_v46 = vrot.slane %v179_v45, 2 }
  0xc9   :  { %v181_v47 = vadd.f32 %v180_v46, %v179_v45 }
  0xcb   :  { %v182_v48 = vrot.slane %v181_v47, 1 }
  0xcd   :  { %v183_v49 = vadd.f32 %v182_v48, %v181_v47 }
  0xcf   :  { %216 = vmatmul.f32.vlgmr.msra.gmra.mxu3 %v183_v49 }
 0x152   :  { %v217_v50 = vpop.f32.mrf.mxu3 }
 0x153   :  { %v220_v51 = vmul.f32 0.001953125, %v217_v50 }
 0x155   :  { %v221_v52 = vperm.slane %v220_v51, 0 }
 0x157   :  { %v222_v53 = vsub.f32 %v171_v36, %v221_v52  ;;  %v223_v54 = vsub.f32 %v172_v34, %v221_v52  ;;  %v224_v55 = vsub.f32 %v173_v37, %v221_v52  ;;  %v225_v56 = vsub.f32 %v174_v42, %v221_v52 }
 0x159   :  { %v226_v57 = vmul.f32 %v222_v53, %v222_v53  ;;  %v227_v58 = vmul.f32 %v223_v54, %v223_v54  ;;  %v228_v59 = vmul.f32 %v224_v55, %v224_v55  ;;  %v229_v61 = vmul.f32 %v225_v56, %v225_v56 }
 0x15b   :  { %v230_v60 = vadd.f32 %v227_v58, %v226_v57 }
 0x15d   :  { %v231_v62 = vadd.f32 %v230_v60, %v228_v59 }
 0x15f   :  { %v232_v63 = vadd.f32 %v231_v62, %v229_v61 }
 0x161   :  { %v233_v0 = vrot.slane %v232_v63, 4 }
 0x163   :  { %v234_v1 = vadd.f32 %v233_v0, %v232_v63 }
 0x165   :  { %v235_v2 = vrot.slane %v234_v1, 2 }
 0x167   :  { %v236_v3 = vadd.f32 %v235_v2, %v234_v1 }
 0x169   :  { %v237_v4 = vrot.slane %v236_v3, 1 }
 0x16b   :  { %v238_v5 = vadd.f32 %v237_v4, %v236_v3 }
 0x16d   :  { %255 = vmatmul.f32.vlgmr.msrb.gmra.mxu0 %v238_v5 }
 0x1ea   :  { %v256_v6 = vpop.f32.mrf.mxu0 }
 0x1eb   :  { %v259_v7 = vmul.f32 0.001953125, %v256_v6 }
 0x1ed   :  { %v260_v8 = vadd.f32 1e-05, %v259_v7 }
 0x1ef   :  { %294 = vrsqrt.f32 %v260_v8  ;;  %vm267_vm1 = vweird.f32 %v260_v8 }
 0x1f5   :  { %v295_v9 = vpop.eup %294 }
 0x1f6   :  { %v262_v10 = vmul.f32 %v295_v9, %v260_v8  ;;  %vm268_vm0 = vweird.f32 %v295_v9 }
 0x1f7   :  { %vm269_vm2 = vmor %vm267_vm1, %vm268_vm0 }
 0x1f8   :  { %v263_v11 = vmul.f32 %v295_v9, %v262_v10 }
 0x1fa   :  { %v264_v12 = vmul.f32 0.5, %v263_v11 }
 0x1fc   :  { %v265_v13 = vsub.f32 1.5, %v264_v12 }
 0x1fe   :  { %v266_v14 = vmul.f32 %v295_v9, %v265_v13 }
 0x200   :  { %v270_v16 = vsel %vm269_vm2, %v295_v9, %v266_v14 }
 0x201   :  { %v272_v17 = vmul.f32 %v271_v15, %v270_v16 }
 0x203   :  { %v273_v18 = vperm.slane %v272_v17, 0 }
 0x205   :  { %v274_v20 = vmul.f32 %v273_v18, %v222_v53  ;;  %v275_v21 = vmul.f32 %v273_v18, %v223_v54  ;;  %v276_v22 = vmul.f32 %v273_v18, %v224_v55  ;;  %v277_v23 = vmul.f32 %v273_v18, %v225_v56 }
 0x207   :  { %v280_v24 = vadd.f32 %v293_v19, %v274_v20  ;;  %v281_v25 = vadd.f32 %v293_v19, %v275_v21  ;;  %v282_v26 = vadd.f32 %v293_v19, %v276_v22  ;;  %v283_v27 = vadd.f32 %v293_v19, %v277_v23 }
 0x209   :  { %284 = vst [vmem:[%s580_s5] sm:$0xff] %v280_v24 }
 0x20a   :  { %285 = vst [vmem:[%s580_s5 + $0x8] sm:$0xff] %v281_v25 }
 0x20b   :  { %286 = vst [vmem:[%s580_s5 + $0x10] sm:$0xff] %v282_v26 }
 0x20c   :  { %287 = vst [vmem:[%s580_s5 + $0x18] sm:$0xff] %v283_v27 }

</bundles_post_ra>
